<compile_context>
chip_gen: v5e
topology: v5e:2x2
jax: 0.10.0
libtpu: 0.0.40
codegen_flags: <defaults>
</compile_context>

<pallas_src>
import functools

import numpy as np
import jax
import jax.numpy as jnp
from jax import lax
from jax.experimental import pallas as pl
from jax.experimental.pallas import tpu as pltpu

F32 = jnp.float32
BF16 = jnp.bfloat16
GN_EPS = 1e-5
GCT_EPS = 1e-5


# ----------------------------- fused conv kernel -----------------------------

def _conv_kernel(*refs, cfg):
    k, H, W = cfg['k'], cfg['H'], cfg['W']
    Cout, d = cfg['Cout'], cfg['dil']
    HW = H * W

    it = iter(refs)
    x_ref = next(it)
    w_ref = next(it)
    gate_ref = next(it) if cfg['gate'] else None
    if cfg['gct']:
        ga_ref = next(it); gg_ref = next(it); gb_ref = next(it)
    if cfg['gn']:
        gamma_ref = next(it); beta_ref = next(it); gproj_ref = next(it)
    res_ref = next(it) if cfg['res'] else None
    rgate_ref = next(it) if cfg['rgate'] else None
    o_ref = next(it)
    if k == 3:
        padw_ref = next(it)   # (rows, Cin) f32 zero-padded, row-flattened sample
        acc_ref = next(it)    # (HW, Cout) f32 compact conv output

    x = x_ref[0]                                            # (HW, Cin)

    if k == 1:
        if cfg['gct'] or cfg['gate']:
            xf = x.astype(F32)
            if cfg['gct']:                                  # l2-mode GCT gate
                ssq = jnp.sum(xf * xf, axis=0, keepdims=True)        # (1, Cin)
                emb = jnp.sqrt(ssq + GCT_EPS) * ga_ref[...]
                nrm = gg_ref[...] * lax.rsqrt(
                    jnp.mean(emb * emb, axis=1, keepdims=True) + GCT_EPS)
                xf = xf * (1.0 + jnp.tanh(emb * nrm + gb_ref[...]))
            if cfg['gate']:                                 # IA channel gate
                xf = xf * gate_ref[0]
            a = xf.astype(BF16)
        else:
            a = x
        y = jnp.dot(a, w_ref[0], preferred_element_type=F32)          # (HW, Cout)
    else:
        # fused im2col: copy sample into a zero-padded row-flattened scratch,
        # then each of the 9 taps is a contiguous shifted slab -> one MXU dot.
        xf = x.astype(F32)
        if cfg['gate']:
            xf = xf * gate_ref[0]
        Wp = W + 2 * d
        HWp = H * Wp
        padw_ref[...] = jnp.zeros_like(padw_ref)
        for h in range(H):
            r0 = (h + d) * Wp + d
            padw_ref[r0:r0 + W, :] = xf[h * W:(h + 1) * W, :]
        wide = None                                         # (H*Wp, Cout) f32
        for t in range(9):
            ky, kx = t // 3, t % 3
            off = (ky * Wp + kx) * d
            lhs = padw_ref[off:off + HWp, :].astype(BF16)
            part = jnp.dot(lhs, w_ref[t], preferred_element_type=F32)
            wide = part if wide is None else wide + part
        for h in range(H):                                  # drop wrap-around cols
            acc_ref[h * W:(h + 1) * W, :] = wide[h * Wp:h * Wp + W, :]
        y = acc_ref[...]

    if cfg['gn']:
        # GroupNorm stats via block-diagonal group-average matrix (MXU dot).
        s = jnp.sum(y, axis=0, keepdims=True)
        ss = jnp.sum(y * y, axis=0, keepdims=True)
        mean = jnp.dot(s, gproj_ref[...], preferred_element_type=F32) * cfg['inv_hw']
        ex2 = jnp.dot(ss, gproj_ref[...], preferred_element_type=F32) * cfg['inv_hw']
        var = jnp.maximum(ex2 - mean * mean, 0.0)
        y = (y - mean) * lax.rsqrt(var + GN_EPS)
        y = y * gamma_ref[...] + beta_ref[...]
    if cfg['res']:
        r = res_ref[0].astype(F32)
        if cfg['rgate']:
            r = r * rgate_ref[0]
        y = y + r
    if cfg['relu']:
        y = jnp.maximum(y, 0.0)
    o_ref[0] = y.astype(o_ref.dtype)


def _conv_pallas(x3, hw, w, *, ksize, dilation=1, gate=None, gct=None, gn=None,
                 relu=False, residual=None, res_gate=None, out_dtype=BF16):
    """x3: (N, H*W, Cin) activations; w: (k*k, Cin, Cout) bf16 weights."""
    x3 = x3.astype(BF16)
    N, HW, Cin = x3.shape
    H, W = hw
    assert H * W == HW
    KK, Cin_w, Cout = w.shape
    assert Cin_w == Cin and KK == ksize * ksize
    if gct is not None:
        assert ksize == 1

    inputs = [x3, w]
    in_specs = [pl.BlockSpec((1, HW, Cin), lambda b: (b, 0, 0)),
                pl.BlockSpec((KK, Cin, Cout), lambda b: (0, 0, 0))]
    if gate is not None:
        inputs.append(gate.astype(F32).reshape(N, 1, Cin))
        in_specs.append(pl.BlockSpec((1, 1, Cin), lambda b: (b, 0, 0)))
    if gct is not None:
        for nm in ('alpha', 'gamma', 'beta'):
            inputs.append(gct[nm].astype(F32).reshape(1, Cin))
            in_specs.append(pl.BlockSpec((1, Cin), lambda b: (0, 0)))
    if gn is not None:
        inputs.append(gn['gamma'].astype(F32).reshape(1, Cout))
        in_specs.append(pl.BlockSpec((1, Cout), lambda b: (0, 0)))
        inputs.append(gn['beta'].astype(F32).reshape(1, Cout))
        in_specs.append(pl.BlockSpec((1, Cout), lambda b: (0, 0)))
        inputs.append(gn['gproj'])
        in_specs.append(pl.BlockSpec((Cout, Cout), lambda b: (0, 0)))
    if residual is not None:
        assert residual.shape == (N, HW, Cout)
        inputs.append(residual)
        in_specs.append(pl.BlockSpec((1, HW, Cout), lambda b: (b, 0, 0)))
    if res_gate is not None:
        inputs.append(res_gate.astype(F32).reshape(N, 1, Cout))
        in_specs.append(pl.BlockSpec((1, 1, Cout), lambda b: (b, 0, 0)))

    scratch = []
    if ksize == 3:
        Wp = W + 2 * dilation
        rows = (H + 2 * dilation) * Wp + 2 * dilation
        scratch = [pltpu.VMEM((rows, Cin), F32),
                   pltpu.VMEM((HW, Cout), F32)]

    cfg = dict(k=ksize, H=H, W=W, Cout=Cout, dil=dilation,
               gate=gate is not None, gct=gct is not None, gn=gn is not None,
               relu=relu, res=residual is not None, rgate=res_gate is not None,
               inv_hw=1.0 / HW)

    flops = 2 * N * HW * Cin * Cout * KK
    bytes_acc = int(sum(int(np.prod(a.shape)) * a.dtype.itemsize for a in inputs)
                    + N * HW * Cout * jnp.dtype(out_dtype).itemsize)

    return pl.pallas_call(
        functools.partial(_conv_kernel, cfg=cfg),
        out_shape=jax.ShapeDtypeStruct((N, HW, Cout), out_dtype),
        grid_spec=pltpu.PrefetchScalarGridSpec(
            num_scalar_prefetch=0,
            grid=(N,),
            in_specs=in_specs,
            out_specs=pl.BlockSpec((1, HW, Cout), lambda b: (b, 0, 0)),
            scratch_shapes=scratch),
        compiler_params=pltpu.CompilerParams(
            dimension_semantics=("parallel",)),
        cost_estimate=pl.CostEstimate(flops=int(flops), transcendentals=0,
                                      bytes_accessed=bytes_acc),
    )(*inputs)


# ----------------------- standalone GroupNorm(+ReLU) kernel ------------------
# Only used after the two stride-2 3x3 convs (GN must see the strided output).

def _gn_act_kernel(x_ref, g_ref, b_ref, p_ref, o_ref, *, inv_hw, relu):
    y = x_ref[0].astype(F32)
    s = jnp.sum(y, axis=0, keepdims=True)
    ss = jnp.sum(y * y, axis=0, keepdims=True)
    mean = jnp.dot(s, p_ref[...], preferred_element_type=F32) * inv_hw
    ex2 = jnp.dot(ss, p_ref[...], preferred_element_type=F32) * inv_hw
    var = jnp.maximum(ex2 - mean * mean, 0.0)
    y = (y - mean) * lax.rsqrt(var + GN_EPS)
    y = y * g_ref[...] + b_ref[...]
    if relu:
        y = jnp.maximum(y, 0.0)
    o_ref[0] = y.astype(o_ref.dtype)


def gn_act(x3, gn, relu):
    N, HW, C = x3.shape
    return pl.pallas_call(
        functools.partial(_gn_act_kernel, inv_hw=1.0 / HW, relu=relu),
        out_shape=jax.ShapeDtypeStruct((N, HW, C), BF16),
        grid_spec=pltpu.PrefetchScalarGridSpec(
            num_scalar_prefetch=0, grid=(N,),
            in_specs=[pl.BlockSpec((1, HW, C), lambda b: (b, 0, 0)),
                      pl.BlockSpec((1, C), lambda b: (0, 0)),
                      pl.BlockSpec((1, C), lambda b: (0, 0)),
                      pl.BlockSpec((C, C), lambda b: (0, 0))],
            out_specs=pl.BlockSpec((1, HW, C), lambda b: (b, 0, 0))),
        compiler_params=pltpu.CompilerParams(dimension_semantics=("parallel",)),
    )(x3, gn['gamma'].astype(F32).reshape(1, C),
      gn['beta'].astype(F32).reshape(1, C), gn['gproj'])


# --------------------------- fused fg/bg IA_logit ----------------------------

def _ia_logit_kernel(x_ref, w_ref, b_ref, o_ref):
    a = x_ref[0]                                          # (HW, C) bf16
    o_ref[0] = jnp.dot(a, w_ref[0], preferred_element_type=F32) + b_ref[0]


def ia_logits(x3, hw, head, p_fg, p_bg):
    N, HW, C = x3.shape
    out_fg = head @ p_fg['w'].T + p_fg['b'][None, :]      # (N, C+1), jnp (tiny)
    out_bg = head @ p_bg['w'].T + p_bg['b'][None, :]
    wfb = jnp.stack([out_fg[:, :C], out_bg[:, :C]], axis=-1).astype(BF16)  # (N,C,2)
    bias = jnp.stack([out_fg[:, C], out_bg[:, C]], axis=-1).reshape(N, 1, 2)
    logit = pl.pallas_call(
        _ia_logit_kernel,
        out_shape=jax.ShapeDtypeStruct((N, HW, 2), F32),
        grid_spec=pltpu.PrefetchScalarGridSpec(
            num_scalar_prefetch=0, grid=(N,),
            in_specs=[pl.BlockSpec((1, HW, C), lambda b: (b, 0, 0)),
                      pl.BlockSpec((1, C, 2), lambda b: (b, 0, 0)),
                      pl.BlockSpec((1, 1, 2), lambda b: (b, 0, 0))],
            out_specs=pl.BlockSpec((1, HW, 2), lambda b: (b, 0, 0))),
        compiler_params=pltpu.CompilerParams(dimension_semantics=("parallel",)),
    )(x3.astype(BF16), wfb, bias.astype(F32))
    H, W = hw
    fg = logit[..., 0].reshape(N, 1, H, W)
    bg = logit[..., 1].reshape(N, 1, H, W)
    return fg, bg


# ------------------------- high-level conv wrapper ---------------------------

def conv_block(x3, hw, w, *, ksize, stride=1, dilation=1, gate=None, gct=None,
               gn=None, relu=False, residual=None, res_gate=None):
    H, W = hw
    N, HW, Cin = x3.shape
    if ksize == 1 and stride != 1:
        x4 = x3.reshape(N, H, W, Cin)[:, ::stride, ::stride, :]
        H, W = x4.shape[1], x4.shape[2]
        x3 = x4.reshape(N, H * W, Cin)
    if ksize == 3 and stride != 1:
        # TODO(synk): stride-2 3x3 computes the stride-1 output then subsamples
        # (wasted 4x MXU work on two tiny layers); GN runs unfused afterwards.
        y = _conv_pallas(x3, (H, W), w, ksize=3, dilation=dilation, gate=gate)
        Cout = w.shape[-1]
        y4 = y.reshape(N, H, W, Cout)[:, ::stride, ::stride, :]
        Ho, Wo = y4.shape[1], y4.shape[2]
        y = y4.reshape(N, Ho * Wo, Cout)
        if gn is not None:
            y = gn_act(y, gn, relu)
        elif relu:
            y = jnp.maximum(y, 0).astype(BF16)
        return y, (Ho, Wo)
    y = _conv_pallas(x3, (H, W), w, ksize=ksize, dilation=dilation, gate=gate,
                     gct=gct, gn=gn, relu=relu, residual=residual,
                     res_gate=res_gate)
    return y, (H, W)


def ia_gate_vec(p, head):
    # Tiny (N, attention_dim) linear -> plain jnp.dot (per perf review).
    return 1.0 + jnp.tanh(head @ p['w'].T + p['b'][None, :])


# ------------------------ bicubic upsample (glue JAX) ------------------------
# TODO(synk): bicubic (align_corners=True, A=-0.75) resize done as separable
# weight matrices in plain JAX glue rather than inside a Pallas kernel.

def _bicubic_matrix(out_size, in_size):
    A = -0.75

    def k1(t):
        return ((A + 2.0) * t - (A + 3.0)) * t * t + 1.0

    def k2(t):
        return ((A * t - 5.0 * A) * t + 8.0 * A) * t - 4.0 * A

    M = np.zeros((out_size, in_size), dtype=np.float32)
    for i in range(out_size):
        src = (i * (in_size - 1) / (out_size - 1)) if out_size > 1 else 0.0
        i0 = int(np.floor(src))
        t = src - i0
        ws = (k2(t + 1.0), k1(t), k1(1.0 - t), k2(2.0 - t))
        for j, wgt in enumerate(ws):
            idx = min(max(i0 - 1 + j, 0), in_size - 1)
            M[i, idx] += wgt
    return jnp.asarray(M)


def bicubic_upsample_nhwc(x4, out_hw):
    Ht, Wt = out_hw
    Mh = _bicubic_matrix(Ht, x4.shape[1])
    Mw = _bicubic_matrix(Wt, x4.shape[2])
    y = jnp.einsum('oh,nhwc->nowc', Mh, x4)
    y = jnp.einsum('pw,nowc->nopc', Mw, y)
    return y


# ------------------------------ parameter init ------------------------------

class ParamFactory:
    def __init__(self, seed=0):
        self._key = jax.random.PRNGKey(seed)
        self._n = 0

    def normal(self, shape, std=0.05):
        self._n += 1
        k = jax.random.fold_in(self._key, self._n)
        return std * jax.random.normal(k, shape, dtype=F32)


def _gn_groups(c):
    for g in (32, 16, 8, 4, 2, 1):
        if c % g == 0:
            return g


def make_gn(c, groups=None):
    g = groups if groups is not None else _gn_groups(c)
    cg = c // g
    ids = np.arange(c) // cg
    proj = (ids[:, None] == ids[None, :]).astype(np.float32) / float(cg)
    return {'gamma': jnp.ones((c,), F32), 'beta': jnp.zeros((c,), F32),
            'groups': g, 'gproj': jnp.asarray(proj)}


def make_linear(pf, in_dim, out_dim):
    return {'w': pf.normal((out_dim, in_dim)), 'b': pf.normal((out_dim,))}


def make_gct(c):
    return {'alpha': jnp.ones((c,), F32), 'gamma': jnp.zeros((c,), F32),
            'beta': jnp.zeros((c,), F32)}


def make_conv(pf, cin, cout, ksize):
    return pf.normal((ksize * ksize, cin, cout)).astype(BF16)


def make_bottleneck(pf, inplanes, outplanes, stride=1, dilation=1):
    planes = outplanes // 4
    p = {'stride': stride, 'dilation': dilation,
         'w1': make_conv(pf, inplanes, planes, 1), 'gn1': make_gn(planes),
         'w2': make_conv(pf, planes, planes, 3), 'gn2': make_gn(planes),
         'w3': make_conv(pf, planes, outplanes, 1), 'gn3': make_gn(outplanes)}
    if stride != 1 or inplanes != outplanes:
        p['wd'] = make_conv(pf, inplanes, outplanes, 1)
        p['gnd'] = make_gn(outplanes)
    return p


def make_aspp(pf, in_dim, out_dim):
    return {'w1': make_conv(pf, in_dim, out_dim, 1), 'gn1': make_gn(out_dim),
            'w2': make_conv(pf, in_dim, out_dim, 3), 'gn2': make_gn(out_dim),
            'w3': make_conv(pf, in_dim, out_dim, 3), 'gn3': make_gn(out_dim),
            'wg': make_conv(pf, in_dim, out_dim, 1), 'gng': make_gn(out_dim),
            'wo': make_conv(pf, 4 * out_dim, out_dim, 1), 'gno': make_gn(out_dim)}


def init_ensembler_params(pf, in_dim_4x, in_dim_8x, in_dim_16x,
                          attention_dim, embed_dim, refine_dim, low_level_dim):
    E = embed_dim
    P = {}
    P['S1_IA1'] = make_linear(pf, attention_dim, in_dim_4x)
    P['S1_layer1'] = make_bottleneck(pf, in_dim_4x, E)
    P['S1_IA2'] = make_linear(pf, attention_dim, E)
    P['S1_layer2'] = make_bottleneck(pf, E, E, 1, 2)
    P['S2_IA1'] = make_linear(pf, attention_dim, E)
    P['S2_layer1'] = make_bottleneck(pf, E, E * 2, 2)
    P['S2_IA2'] = make_linear(pf, attention_dim, E * 2 + in_dim_8x)
    P['S2_layer2'] = make_bottleneck(pf, E * 2 + in_dim_8x, E * 2, 1, 2)
    P['S2_IA3'] = make_linear(pf, attention_dim, E * 2)
    P['S2_layer3'] = make_bottleneck(pf, E * 2, E * 2, 1, 4)
    P['S3_IA1'] = make_linear(pf, attention_dim, E * 2)
    P['S3_layer1'] = make_bottleneck(pf, E * 2, E * 2, 2)
    P['S3_IA2'] = make_linear(pf, attention_dim, E * 2 + in_dim_16x)
    P['S3_layer2'] = make_bottleneck(pf, E * 2 + in_dim_16x, E * 2, 1, 2)
    P['S3_IA3'] = make_linear(pf, attention_dim, E * 2)
    P['S3_layer3'] = make_bottleneck(pf, E * 2, E * 2, 1, 4)
    P['ASPP_IA'] = make_linear(pf, attention_dim, E * 2)
    P['ASPP'] = make_aspp(pf, E * 2, E)
    P['GCT_sc'] = make_gct(low_level_dim + E)
    P['conv_sc'] = make_conv(pf, low_level_dim + E, refine_dim, 1)
    P['bn_sc'] = make_gn(refine_dim, groups=refine_dim // 4)
    P['IA10'] = make_linear(pf, attention_dim, E + refine_dim)
    P['conv1'] = make_conv(pf, E + refine_dim, E // 2, 3)
    P['bn1'] = make_gn(E // 2, groups=32)
    P['IA11'] = make_linear(pf, attention_dim, E // 2)
    P['conv2'] = make_conv(pf, E // 2, E // 2, 3)
    P['bn2'] = make_gn(E // 2, groups=32)
    P['IA_final_fg'] = make_linear(pf, attention_dim, E // 2 + 1)
    P['IA_final_bg'] = make_linear(pf, attention_dim, E // 2 + 1)
    return P


# --------------------------------- modules ----------------------------------

def bottleneck(p, x3, hw, gate=None):
    s, d = p['stride'], p['dilation']
    out, hw1 = conv_block(x3, hw, p['w1'], ksize=1, gate=gate,
                          gn=p['gn1'], relu=True)
    out, hw2 = conv_block(out, hw1, p['w2'], ksize=3, stride=s, dilation=d,
                          gn=p['gn2'], relu=True)
    if 'wd' in p:
        res, _ = conv_block(x3, hw, p['wd'], ksize=1, stride=s, gate=gate,
                            gn=p['gnd'], relu=False)
        res_gate = None
    else:
        res = x3           # raw (ungated) input; gate is applied in the epilogue
        res_gate = gate
    out, hw3 = conv_block(out, hw2, p['w3'], ksize=1, gn=p['gn3'], relu=True,
                          residual=res, res_gate=res_gate)
    return out, hw3


def aspp(p, x3, hw, gate):
    b1, _ = conv_block(x3, hw, p['w1'], ksize=1, gate=gate, gn=p['gn1'], relu=True)
    b2, _ = conv_block(x3, hw, p['w2'], ksize=3, dilation=2, gate=gate,
                       gn=p['gn2'], relu=True)
    b3, _ = conv_block(x3, hw, p['w3'], ksize=3, dilation=4, gate=gate,
                       gn=p['gn3'], relu=True)
    # pooling commutes with the per-channel gate; gate is fused into the 1x1 conv
    gp = jnp.mean(x3.astype(F32), axis=1, keepdims=True).astype(BF16)   # (N,1,C)
    gpo, _ = conv_block(gp, (1, 1), p['wg'], ksize=1, gate=gate,
                        gn=p['gng'], relu=True)
    gpo = jnp.broadcast_to(gpo, b1.shape)
    cat = jnp.concatenate([b1, b2, b3, gpo], axis=-1)
    out, _ = conv_block(cat, hw, p['wo'], ksize=1, gn=p['gno'], relu=True)
    return out, hw


def decoder(P, x3, hw, llf3, llf_hw, head):
    N, _, C = x3.shape
    x4 = x3.reshape(N, hw[0], hw[1], C).astype(F32)
    x4 = bicubic_upsample_nhwc(x4, llf_hw)
    Hl, Wl = llf_hw
    xu = x4.reshape(N, Hl * Wl, C).astype(BF16)
    sc, _ = conv_block(llf3, llf_hw, P['conv_sc'], ksize=1, gct=P['GCT_sc'],
                       gn=P['bn_sc'], relu=True)
    x = jnp.concatenate([xu, sc], axis=-1)
    x, _ = conv_block(x, llf_hw, P['conv1'], ksize=3, dilation=1,
                      gate=ia_gate_vec(P['IA10'], head), gn=P['bn1'], relu=True)
    x, _ = conv_block(x, llf_hw, P['conv2'], ksize=3, dilation=1,
                      gate=ia_gate_vec(P['IA11'], head), gn=P['bn2'], relu=True)
    return x, llf_hw


def augment_background_logit(fg_logit, bg_logit):
    n = fg_logit.shape[0]
    pred = fg_logit
    if n > 1:
        aug = jnp.min(bg_logit[1:n], axis=0, keepdims=True)
        pad = jnp.zeros((n - 1,) + aug.shape[1:], aug.dtype)
        pred = pred + jnp.concatenate([aug, pad], axis=0)
    return jnp.transpose(pred, (1, 0, 2, 3))


def collaborative_ensembler_forward(P, all_x, all_IA_head, low_level_feat):
    x_4x, x_8x, x_16x = all_x
    head = all_IA_head[0]

    def to_flat(t):
        n, c, h, w = t.shape
        return (jnp.transpose(t, (0, 2, 3, 1)).reshape(n, h * w, c).astype(BF16),
                (h, w))

    x4f, hw4 = to_flat(x_4x)
    x8f, _ = to_flat(x_8x)
    x16f, _ = to_flat(x_16x)
    llf_raw, _ = to_flat(low_level_feat)
    N = x4f.shape[0]

    x, hw = bottleneck(P['S1_layer1'], x4f, hw4, gate=ia_gate_vec(P['S1_IA1'], head))
    x, hw = bottleneck(P['S1_layer2'], x, hw, gate=ia_gate_vec(P['S1_IA2'], head))
    llf = jnp.concatenate(
        [jnp.broadcast_to(llf_raw, (N,) + llf_raw.shape[1:]), x], axis=-1)
    x, hw = bottleneck(P['S2_layer1'], x, hw, gate=ia_gate_vec(P['S2_IA1'], head))
    x = jnp.concatenate([x, x8f], axis=-1)
    x, hw = bottleneck(P['S2_layer2'], x, hw, gate=ia_gate_vec(P['S2_IA2'], head))
    x, hw = bottleneck(P['S2_layer3'], x, hw, gate=ia_gate_vec(P['S2_IA3'], head))
    x, hw = bottleneck(P['S3_layer1'], x, hw, gate=ia_gate_vec(P['S3_IA1'], head))
    x = jnp.concatenate([x, x16f], axis=-1)
    x, hw = bottleneck(P['S3_layer2'], x, hw, gate=ia_gate_vec(P['S3_IA2'], head))
    x, hw = bottleneck(P['S3_layer3'], x, hw, gate=ia_gate_vec(P['S3_IA3'], head))
    x, hw = aspp(P['ASPP'], x, hw, gate=ia_gate_vec(P['ASPP_IA'], head))
    x, hw = decoder(P, x, hw, llf, hw4, head)
    fg, bg = ia_logits(x, hw, head, P['IA_final_fg'], P['IA_final_bg'])
    return augment_background_logit(fg, bg)


# ----------------------------------- main ------------------------------------

if __name__ == "__main__":
    # Small synthetic configuration (dims chosen so all GroupNorms are valid).
    in_dim_4x, in_dim_8x, in_dim_16x = 64, 32, 32
    attention_dim, embed_dim, refine_dim, low_level_dim = 64, 64, 48, 64
    N = 2                                   # number of objects
    H4 = W4 = 16
    H8 = W8 = 8
    H16 = W16 = 4

    pf = ParamFactory(0)
    params = init_ensembler_params(pf, in_dim_4x, in_dim_8x, in_dim_16x,
                                   attention_dim, embed_dim, refine_dim,
                                   low_level_dim)

    key = jax.random.PRNGKey(0)
    k1, k2, k3, k4, k5 = jax.random.split(key, 5)
    x_4x = jax.random.normal(k1, (N, in_dim_4x, H4, W4), F32)
    x_8x = jax.random.normal(k2, (N, in_dim_8x, H8, W8), F32)
    x_16x = jax.random.normal(k3, (N, in_dim_16x, H16, W16), F32)
    IA_head = jax.random.normal(k4, (N, attention_dim), F32)
    low_level_feat = jax.random.normal(k5, (1, low_level_dim, H4, W4), F32)

    pred = collaborative_ensembler_forward(
        params, (x_4x, x_8x, x_16x), [IA_head], low_level_feat)
    pred = jax.block_until_ready(pred)
    assert pred.shape == (1, N, H4, W4), pred.shape
    assert bool(jnp.all(jnp.isfinite(pred)))
    print("KERNEL_OK")
</pallas_src>

<mosaic_0001>
module attributes {stable_mosaic.version = 11 : i64} {
  func.func @_conv_kernel(%arg0: i32, %arg1: memref<1x256x64xbf16, #tpu.memory_space<vmem>>, %arg2: memref<1x64x16xbf16, #tpu.memory_space<vmem>>, %arg3: memref<1x1x64xf32, #tpu.memory_space<vmem>>, %arg4: memref<1x16xf32, #tpu.memory_space<vmem>>, %arg5: memref<1x16xf32, #tpu.memory_space<vmem>>, %arg6: memref<16x16xf32, #tpu.memory_space<vmem>>, %arg7: memref<1x256x16xbf16, #tpu.memory_space<vmem>>) attributes {dimension_semantics = [#tpu.dimension_semantics<parallel>], iteration_bounds = array<i64: 2>, scalar_prefetch = 0 : i64, scratch_operands = 0 : i64, tpu.core_type = #tpu.core_type<tc>, window_params = [{transform_indices = @transform_0, window_bounds = array<i64: 1, 256, 64>}, {pipeline_mode = #tpu.pipeline_mode<synchronous>, transform_indices = @transform_1, window_bounds = array<i64: 1, 64, 16>}, {transform_indices = @transform_2, window_bounds = array<i64: 1, 1, 64>}, {pipeline_mode = #tpu.pipeline_mode<synchronous>, transform_indices = @transform_3, window_bounds = array<i64: 1, 16>}, {pipeline_mode = #tpu.pipeline_mode<synchronous>, transform_indices = @transform_4, window_bounds = array<i64: 1, 16>}, {pipeline_mode = #tpu.pipeline_mode<synchronous>, transform_indices = @transform_5, window_bounds = array<i64: 16, 16>}, {transform_indices = @transform_6, window_bounds = array<i64: 1, 256, 16>}]} {
    %c0 = arith.constant 0 : index
    %c0_0 = arith.constant 0 : index
    %c0_1 = arith.constant 0 : index
    %0 = vector.load %arg1[%c0, %c0_0, %c0_1] : memref<1x256x64xbf16, #tpu.memory_space<vmem>>, vector<1x256x64xbf16>
    %1 = vector.shape_cast %0 : vector<1x256x64xbf16> to vector<256x64xbf16>
    %2 = arith.extf %1 : vector<256x64xbf16> to vector<256x64xf32>
    %c0_2 = arith.constant 0 : index
    %c0_3 = arith.constant 0 : index
    %c0_4 = arith.constant 0 : index
    %3 = vector.load %arg3[%c0_2, %c0_3, %c0_4] : memref<1x1x64xf32, #tpu.memory_space<vmem>>, vector<1x1x64xf32>
    %4 = vector.shape_cast %3 : vector<1x1x64xf32> to vector<1x64xf32>
    %5 = vector.broadcast %4 : vector<1x64xf32> to vector<256x64xf32>
    %6 = arith.mulf %2, %5 : vector<256x64xf32>
    %7 = arith.truncf %6 : vector<256x64xf32> to vector<256x64xbf16>
    %c0_5 = arith.constant 0 : index
    %c0_6 = arith.constant 0 : index
    %c0_7 = arith.constant 0 : index
    %8 = vector.load %arg2[%c0_5, %c0_6, %c0_7] : memref<1x64x16xbf16, #tpu.memory_space<vmem>>, vector<1x64x16xbf16>
    %9 = vector.shape_cast %8 : vector<1x64x16xbf16> to vector<64x16xbf16>
    %cst = arith.constant dense<0.000000e+00> : vector<256x16xf32>
    %10 = tpu.matmul %7, %9, %cst {dimension_numbers = #tpu.dot_dimension_numbers<[1], [0], [0], [1], [0, 0, 1, 1], [], []>} : vector<256x64xbf16>, vector<64x16xbf16>, vector<256x16xf32> -> vector<256x16xf32>
    %cst_8 = arith.constant dense<0.000000e+00> : vector<16xf32>
    %11 = vector.multi_reduction <add>, %10, %cst_8 [0] : vector<256x16xf32> to vector<16xf32>
    %12 = vector.shape_cast %11 : vector<16xf32> to vector<1x16xf32>
    %13 = arith.mulf %10, %10 : vector<256x16xf32>
    %cst_9 = arith.constant dense<0.000000e+00> : vector<16xf32>
    %14 = vector.multi_reduction <add>, %13, %cst_9 [0] : vector<256x16xf32> to vector<16xf32>
    %15 = vector.shape_cast %14 : vector<16xf32> to vector<1x16xf32>
    %c0_10 = arith.constant 0 : index
    %c0_11 = arith.constant 0 : index
    %16 = vector.load %arg6[%c0_10, %c0_11] : memref<16x16xf32, #tpu.memory_space<vmem>>, vector<16x16xf32>
    %cst_12 = arith.constant dense<0.000000e+00> : vector<1x16xf32>
    %17 = tpu.matmul %12, %16, %cst_12 {dimension_numbers = #tpu.dot_dimension_numbers<[1], [0], [0], [1], [0, 0, 1, 1], [], []>} : vector<1x16xf32>, vector<16x16xf32>, vector<1x16xf32> -> vector<1x16xf32>
    %cst_13 = arith.constant 3.906250e-03 : f32
    %18 = vector.broadcast %cst_13 : f32 to vector<1x16xf32>
    %19 = arith.mulf %17, %18 : vector<1x16xf32>
    %c0_14 = arith.constant 0 : index
    %c0_15 = arith.constant 0 : index
    %20 = vector.load %arg6[%c0_14, %c0_15] : memref<16x16xf32, #tpu.memory_space<vmem>>, vector<16x16xf32>
    %cst_16 = arith.constant dense<0.000000e+00> : vector<1x16xf32>
    %21 = tpu.matmul %15, %20, %cst_16 {dimension_numbers = #tpu.dot_dimension_numbers<[1], [0], [0], [1], [0, 0, 1, 1], [], []>} : vector<1x16xf32>, vector<16x16xf32>, vector<1x16xf32> -> vector<1x16xf32>
    %cst_17 = arith.constant 3.906250e-03 : f32
    %22 = vector.broadcast %cst_17 : f32 to vector<1x16xf32>
    %23 = arith.mulf %21, %22 : vector<1x16xf32>
    %24 = arith.mulf %19, %19 : vector<1x16xf32>
    %25 = arith.subf %23, %24 : vector<1x16xf32>
    %cst_18 = arith.constant 0.000000e+00 : f32
    %26 = vector.broadcast %cst_18 : f32 to vector<1x16xf32>
    %27 = arith.maximumf %25, %26 : vector<1x16xf32>
    %28 = vector.broadcast %19 : vector<1x16xf32> to vector<256x16xf32>
    %29 = arith.subf %10, %28 : vector<256x16xf32>
    %cst_19 = arith.constant 9.99999974E-6 : f32
    %30 = vector.broadcast %cst_19 : f32 to vector<1x16xf32>
    %31 = arith.addf %27, %30 : vector<1x16xf32>
    %32 = math.rsqrt %31 : vector<1x16xf32>
    %33 = vector.broadcast %32 : vector<1x16xf32> to vector<256x16xf32>
    %34 = arith.mulf %29, %33 : vector<256x16xf32>
    %c0_20 = arith.constant 0 : index
    %c0_21 = arith.constant 0 : index
    %35 = vector.load %arg4[%c0_20, %c0_21] : memref<1x16xf32, #tpu.memory_space<vmem>>, vector<1x16xf32>
    %36 = vector.broadcast %35 : vector<1x16xf32> to vector<256x16xf32>
    %37 = arith.mulf %34, %36 : vector<256x16xf32>
    %c0_22 = arith.constant 0 : index
    %c0_23 = arith.constant 0 : index
    %38 = vector.load %arg5[%c0_22, %c0_23] : memref<1x16xf32, #tpu.memory_space<vmem>>, vector<1x16xf32>
    %39 = vector.broadcast %38 : vector<1x16xf32> to vector<256x16xf32>
    %40 = arith.addf %37, %39 : vector<256x16xf32>
    %cst_24 = arith.constant 0.000000e+00 : f32
    %41 = vector.broadcast %cst_24 : f32 to vector<256x16xf32>
    %42 = arith.maximumf %40, %41 : vector<256x16xf32>
    %43 = arith.truncf %42 : vector<256x16xf32> to vector<256x16xbf16>
    %c0_25 = arith.constant 0 : index
    %c0_26 = arith.constant 0 : index
    %c0_27 = arith.constant 0 : index
    %44 = vector.load %arg7[%c0_25, %c0_26, %c0_27] : memref<1x256x16xbf16, #tpu.memory_space<vmem>>, vector<1x256x16xbf16>
    %45 = vector.shape_cast %44 : vector<1x256x16xbf16> to vector<256x16xbf16>
    %46 = vector.shape_cast %43 : vector<256x16xbf16> to vector<1x256x16xbf16>
    tpu.vector_store %arg7[%c0_25, %c0_26, %c0_27], %46 {strides = array<i32>} : memref<1x256x16xbf16, #tpu.memory_space<vmem>>, vector<1x256x16xbf16>,
    return
  }
  func.func @transform_0(%arg0: i32) -> (i32, i32, i32) {
    %c0_i32 = arith.constant 0 : i32
    %c0_i32_0 = arith.constant 0 : i32
    %c0_i32_1 = arith.constant 0 : i32
    return %arg0, %c0_i32, %c0_i32_0 : i32, i32, i32
  }
  func.func @transform_1(%arg0: i32) -> (i32, i32, i32) {
    %c0_i32 = arith.constant 0 : i32
    %c0_i32_0 = arith.constant 0 : i32
    %c0_i32_1 = arith.constant 0 : i32
    %c0_i32_2 = arith.constant 0 : i32
    return %c0_i32, %c0_i32_0, %c0_i32_1 : i32, i32, i32
  }
  func.func @transform_2(%arg0: i32) -> (i32, i32, i32) {
    %c0_i32 = arith.constant 0 : i32
    %c0_i32_0 = arith.constant 0 : i32
    %c0_i32_1 = arith.constant 0 : i32
    return %arg0, %c0_i32, %c0_i32_0 : i32, i32, i32
  }
  func.func @transform_3(%arg0: i32) -> (i32, i32) {
    %c0_i32 = arith.constant 0 : i32
    %c0_i32_0 = arith.constant 0 : i32
    %c0_i32_1 = arith.constant 0 : i32
    return %c0_i32, %c0_i32_0 : i32, i32
  }
  func.func @transform_4(%arg0: i32) -> (i32, i32) {
    %c0_i32 = arith.constant 0 : i32
    %c0_i32_0 = arith.constant 0 : i32
    %c0_i32_1 = arith.constant 0 : i32
    return %c0_i32, %c0_i32_0 : i32, i32
  }
  func.func @transform_5(%arg0: i32) -> (i32, i32) {
    %c0_i32 = arith.constant 0 : i32
    %c0_i32_0 = arith.constant 0 : i32
    %c0_i32_1 = arith.constant 0 : i32
    return %c0_i32, %c0_i32_0 : i32, i32
  }
  func.func @transform_6(%arg0: i32) -> (i32, i32, i32) {
    %c0_i32 = arith.constant 0 : i32
    %c0_i32_0 = arith.constant 0 : i32
    %c0_i32_1 = arith.constant 0 : i32
    return %arg0, %c0_i32, %c0_i32_0 : i32, i32, i32
  }
}

</mosaic_0001>

<bundles_post_ra>
// kernel: tpu_custom_call.1
= control target key start
LH: loop header
LB: loop body
LE: loop exit
PB: predicated region body
PF: predicated region fallthrough
CT: control target
= control target key end

     0   :  { %s1285_s21 = smov 0   ;;  %s1907_s0 = inlined_call_operand.vmem [shape: bf16[2,256,64], index: 0, kind: input, shape index: {}]   ;;  %s1908_s1 = inlined_call_operand.vmem [shape: bf16[1,64,16], index: 1, kind: input, shape index: {}]   ;;  %s1909_s2 = inlined_call_operand.vmem [shape: f32[2,1,64], index: 2, kind: input, shape index: {}]   ;;  %s1910_s3 = inlined_call_operand.vmem [shape: f32[1,16], index: 3, kind: input, shape index: {}]   ;;  %s1911_s4 = inlined_call_operand.vmem [shape: f32[1,16], index: 4, kind: input, shape index: {}]   ;;  %s1912_s5 = inlined_call_operand.vmem [shape: f32[16,16], index: 5, kind: input, shape index: {}]   ;;  %s1913_s6 = inlined_call_operand.vmem [shape: bf16[2,256,16], index: 6, kind: output, shape index: {}]  }
   0x1 LB: > { %s1087_s22 = sadd.s32 4294967295, %s1248_s21   ;;  %p1091_p0 = scmp.ge.s32.totalorder %s1248_s21, 1  ;;  %s1248_s21 = sphi %s1285_s21, %s16_s21  }
   0x2   : > { %p220_p1 = scmp.lt.s32.totalorder %s1248_s21, 3 }
   0x4   : > { %p221_p2 = pnand %p1091_p0, %p220_p1 }
   0x5   : > { %p253_p3 = scmp.lt.s32.totalorder (!%p221_p2), %s1087_s22, 1 }
   0x6   : > { %224 = sbr.rel (%p221_p2) target bundleno = 483 (0x1e3), region = 44 }
   0xb   : > { %v1137_v0 = vld [vmem:[%s1908_s1 + $0x18] sm:$0xff]  ;;  %v1136_v1 = vld [vmem:[%s1908_s1 + $0x10] sm:$0xff]  ;;  %s1915_s22 = smov (!%p253_p3, %s1087_s22), 1  ;;  %v1135_v3 = vld [vmem:[%s1908_s1 + $0x8] sm:$0xff]  ;;  %vm415_vm0 = vcmask 523264   ;;  %vm553_vm1 = vcmask 130048  }
   0xc   : > { %468 = vmatpush.bf16.msra.mxu0 %v1137_v0  ;;  %1217 = vmatpush.bf16.msra.mxu1 %v1137_v0  ;;  %s1132_s27 = sshll.u32 %s1915_s22, 7  ;;  %s260_s30 = scalar_lea.vmem %s1909_s2, %s1915_s22  ;;  %v1134_v18 = vld [vmem:[%s1908_s1] sm:$0xff]  ;;  %vm990_vm5 = vcmask 125952  }
   0xd   : > { %1219 = vmatpush.bf16.msra.mxu3 %v1137_v0  ;;  %1218 = vmatpush.bf16.msra.mxu2 %v1137_v0  ;;  %s1311_s9 = scalar_lea.vmem %s1907_s0, %s1132_s27  ;;  %v1313_v2 = vld [vmem:[%s260_s30] ss:$0 sm:$0xff]  ;;  %s1783_s26 = scalar_lea.vmem %s1913_s6, %s1132_s27 }
   0xe   : > { %v1139_v4 = vld [vmem:[%s1311_s9] sm:$0xff]   ;;  %v1212_v10 = vld [vmem:[%s1311_s9 + $0x58] sm:$0xff]   ;;  %v1202_v29 = vld [vmem:[%s1311_s9 + $0x8] sm:$0xff]  }
   0xf   : > { %v1205_v5 = vld [vmem:[%s1311_s9 + $0x20] sm:$0xff]   ;;  %v1140_v6 = vunpack.c.l.bf16 %v1139_v4  ;;  %v1141_v7 = vunpack.c.h.bf16 %v1139_v4  ;;  %v1184_v11 = vunpack.c.l.bf16 %v1212_v10  ;;  %v1185_v12 = vunpack.c.h.bf16 %v1212_v10  ;;  %v1206_v30 = vld [vmem:[%s1311_s9 + $0x28] sm:$0xff]   ;;  %v1203_v53 = vld [vmem:[%s1311_s9 + $0x10] sm:$0xff]  }
  0x10   : > { %469 = vmatpush.bf16.msra.mxu0 %v1136_v1  ;;  %1220 = vmatpush.bf16.msra.mxu1 %v1136_v1  ;;  %v1156_v8 = vunpack.c.l.bf16 %v1205_v5  ;;  %v1157_v9 = vunpack.c.h.bf16 %v1205_v5  ;;  %v1209_v17 = vld [vmem:[%s1311_s9 + $0x40] sm:$0xff]   ;;  %v1210_v32 = vld [vmem:[%s1311_s9 + $0x48] sm:$0xff]   ;;  %v1144_v33 = vunpack.c.l.bf16 %v1202_v29  ;;  %v1145_v34 = vunpack.c.h.bf16 %v1202_v29  ;;  %v1207_v54 = vld [vmem:[%s1311_s9 + $0x30] sm:$0xff]  }
  0x11   : > { %1222 = vmatpush.bf16.msra.mxu3 %v1136_v1  ;;  %1221 = vmatpush.bf16.msra.mxu2 %v1136_v1  ;;  %v335_v13 = vmul.f32 %v1313_v2, %v1140_v6  ;;  %v336_v14 = vmul.f32 %v1313_v2, %v1141_v7  ;;  %v357_v19 = vmul.f32 %v1313_v2, %v1184_v11  ;;  %v1172_v21 = vunpack.c.l.bf16 %v1209_v17  ;;  %v1213_v31 = vld [vmem:[%s1311_s9 + $0x60] sm:$0xff]   ;;  %v1216_v55 = vld [vmem:[%s1311_s9 + $0x78] sm:$0xff]   ;;  %v1214_v56 = vld [vmem:[%s1311_s9 + $0x68] sm:$0xff]  }
  0x12   : > { %v343_v15 = vmul.f32 %v1313_v2, %v1156_v8  ;;  %v344_v16 = vmul.f32 %v1313_v2, %v1157_v9  ;;  %v358_v20 = vmul.f32 %v1313_v2, %v1185_v12  ;;  %v1173_v22 = vunpack.c.h.bf16 %v1209_v17  ;;  %v1211_v57 = vld [vmem:[%s1311_s9 + $0x50] sm:$0xff]  }
  0x13   : > { %v367_v23 = vpack.c.bf16 %v336_v14, %v335_v13  ;;  %v351_v26 = vmul.f32 %v1313_v2, %v1172_v21  ;;  %v1160_v35 = vunpack.c.l.bf16 %v1206_v30  ;;  %v1161_v36 = vunpack.c.h.bf16 %v1206_v30  ;;  %v1208_v21 = vld [vmem:[%s1311_s9 + $0x38] sm:$0xff]  }
  0x14   : > { %470 = vmatpush.bf16.msra.mxu0 %v1135_v3  ;;  %1223 = vmatpush.bf16.msra.mxu1 %v1135_v3  ;;  %v371_v24 = vpack.c.bf16 %v344_v16, %v343_v15  ;;  %v378_v25 = vpack.c.bf16 %v358_v20, %v357_v19  ;;  %v352_v27 = vmul.f32 %v1313_v2, %v1173_v22  ;;  %v1188_v37 = vunpack.c.l.bf16 %v1213_v31  ;;  %v1204_v20 = vld [vmem:[%s1311_s9 + $0x18] sm:$0xff]   ;;  %v1215_v22 = vld [vmem:[%s1311_s9 + $0x70] sm:$0xff]  }
  0x15   : > { %1225 = vmatpush.bf16.msra.mxu3 %v1135_v3  ;;  %1224 = vmatpush.bf16.msra.mxu2 %v1135_v3  ;;  %v1189_v38 = vunpack.c.h.bf16 %v1213_v31  ;;  %v1176_v39 = vunpack.c.l.bf16 %v1210_v32  ;;  %v1177_v40 = vunpack.c.h.bf16 %v1210_v32  ;;  %v337_v41 = vmul.f32 %v1313_v2, %v1144_v33 }
  0x16   : > { %v375_v28 = vpack.c.bf16 %v352_v27, %v351_v26  ;;  %v338_v42 = vmul.f32 %v1313_v2, %v1145_v34  ;;  %v345_v43 = vmul.f32 %v1313_v2, %v1160_v35  ;;  %v346_v44 = vmul.f32 %v1313_v2, %v1161_v36 }
  0x17   : > { %v359_v45 = vmul.f32 %v1313_v2, %v1188_v37  ;;  %v360_v46 = vmul.f32 %v1313_v2, %v1189_v38  ;;  %v353_v47 = vmul.f32 %v1313_v2, %v1176_v39  ;;  %v354_v48 = vmul.f32 %v1313_v2, %v1177_v40 }
  0x18   : > { %471 = vmatpush.bf16.msra.mxu0 %v1134_v18  ;;  %1226 = vmatpush.bf16.msra.mxu1 %v1134_v18  ;;  %v368_v49 = vpack.c.bf16 %v338_v42, %v337_v41  ;;  %v372_v50 = vpack.c.bf16 %v346_v44, %v345_v43  ;;  %v1200_v58 = vunpack.c.l.bf16 %v1216_v55  ;;  %v1201_v59 = vunpack.c.h.bf16 %v1216_v55  ;;  %v725_v55 = vld [vmem:[%s1912_s5 + $0x8] sm:$0xff] }
  0x19   : > { %1228 = vmatpush.bf16.msra.mxu3 %v1134_v18  ;;  %1227 = vmatpush.bf16.msra.mxu2 %v1134_v18  ;;  %v379_v51 = vpack.c.bf16 %v360_v46, %v359_v45  ;;  %v376_v52 = vpack.c.bf16 %v354_v48, %v353_v47  ;;  %v1148_v60 = vunpack.c.l.bf16 %v1203_v53  ;;  %v1149_v61 = vunpack.c.h.bf16 %v1203_v53 }
  0x1a   : > { %v1164_v62 = vunpack.c.l.bf16 %v1207_v54  ;;  %v1165_v63 = vunpack.c.h.bf16 %v1207_v54  ;;  %v365_v0 = vmul.f32 %v1313_v2, %v1200_v58  ;;  %v366_v1 = vmul.f32 %v1313_v2, %v1201_v59 }
  0x1b   : > { %1112 = vmatmul.msk.bf16.vlgmr.msra.gmra.mxu0 %vm415_vm0, %v367_v23  ;;  %1116 = vmatmul.msk.bf16.vlgmr.msra.gmra.mxu1 %vm415_vm0, %v371_v24  ;;  %v1192_v3 = vunpack.c.l.bf16 %v1214_v56  ;;  %v1193_v4 = vunpack.c.h.bf16 %v1214_v56  ;;  %v1180_v5 = vunpack.c.l.bf16 %v1211_v57  ;;  %v1181_v6 = vunpack.c.h.bf16 %v1211_v57 }
  0x1c   : > { %1123 = vmatmul.msk.bf16.vlgmr.msra.gmra.mxu3 %vm415_vm0, %v378_v25  ;;  %1120 = vmatmul.msk.bf16.vlgmr.msra.gmra.mxu2 %vm415_vm0, %v375_v28  ;;  %v382_v7 = vpack.c.bf16 %v366_v1, %v365_v0  ;;  %v339_v8 = vmul.f32 %v1313_v2, %v1148_v60  ;;  %v340_v9 = vmul.f32 %v1313_v2, %v1149_v61  ;;  %v1152_v23 = vunpack.c.l.bf16 %v1204_v20 }
  0x1d   : > { %v347_v10 = vmul.f32 %v1313_v2, %v1164_v62  ;;  %v348_v11 = vmul.f32 %v1313_v2, %v1165_v63  ;;  %v361_v12 = vmul.f32 %v1313_v2, %v1192_v3  ;;  %v362_v13 = vmul.f32 %v1313_v2, %v1193_v4  ;;  %743 = vmatpush.msrb.mxu1 %v725_v55 }
  0x1e   : > { %v355_v14 = vmul.f32 %v1313_v2, %v1180_v5  ;;  %v356_v15 = vmul.f32 %v1313_v2, %v1181_v6  ;;  %v369_v16 = vpack.c.bf16 %v340_v9, %v339_v8  ;;  %v1153_v24 = vunpack.c.h.bf16 %v1204_v20  ;;  %767 = vmatpush.msrb.mxu2 %v725_v55 }
  0x1f   : > { %v373_v17 = vpack.c.bf16 %v348_v11, %v347_v10  ;;  %v380_v18 = vpack.c.bf16 %v362_v13, %v361_v12  ;;  %v1168_v25 = vunpack.c.l.bf16 %v1208_v21  ;;  %v1169_v26 = vunpack.c.h.bf16 %v1208_v21 }
  0x20   : > { %v377_v19 = vpack.c.bf16 %v356_v15, %v355_v14  ;;  %v1196_v27 = vunpack.c.l.bf16 %v1215_v22  ;;  %v1197_v28 = vunpack.c.h.bf16 %v1215_v22  ;;  %v341_v29 = vmul.f32 %v1313_v2, %v1152_v23 }
  0x21   : > { %v342_v30 = vmul.f32 %v1313_v2, %v1153_v24  ;;  %v349_v31 = vmul.f32 %v1313_v2, %v1168_v25  ;;  %v350_v32 = vmul.f32 %v1313_v2, %v1169_v26 }
  0x22   : > { %v363_v33 = vmul.f32 %v1313_v2, %v1196_v27  ;;  %v364_v34 = vmul.f32 %v1313_v2, %v1197_v28 }
  0x23   : > { %v370_v35 = vpack.c.bf16 %v342_v30, %v341_v29  ;;  %v374_v36 = vpack.c.bf16 %v350_v32, %v349_v31 }
  0x24   : > { %v381_v37 = vpack.c.bf16 %v364_v34, %v363_v33 }
  0x2b   : > { %1113 = vmatmul.msk.bf16.gmra.mxu0 %vm415_vm0, %v368_v49  ;;  %1117 = vmatmul.msk.bf16.gmra.mxu1 %vm415_vm0, %v372_v50 }
  0x2c   : > { %1124 = vmatmul.msk.bf16.gmra.mxu3 %vm415_vm0, %v379_v51  ;;  %1121 = vmatmul.msk.bf16.gmra.mxu2 %vm415_vm0, %v376_v52 }
  0x3b   : > { %1114 = vmatmul.msk.bf16.gmra.mxu0 %vm415_vm0, %v369_v16  ;;  %1118 = vmatmul.msk.bf16.gmra.mxu1 %vm415_vm0, %v373_v17 }
  0x3c   : > { %1125 = vmatmul.msk.bf16.gmra.mxu3 %vm415_vm0, %v380_v18  ;;  %1122 = vmatmul.msk.bf16.gmra.mxu2 %vm415_vm0, %v377_v19 }
  0x4b   : > { %1115 = vmatmul.msk.bf16.gmra.mxu0 %vm415_vm0, %v370_v35  ;;  %1119 = vmatmul.msk.bf16.gmra.mxu1 %vm415_vm0, %v374_v36 }
  0x4c   : > { %1126 = vmatmul.msk.bf16.gmra.mxu3 %vm415_vm0, %v381_v37 }
  0x5c   : > { %1127 = vmatmul.msk.bf16.gmra.mxu3 %vm415_vm0, %v382_v7 }
  0x98   : > { %v1385_v38 = vpop.f32.mrf.mxu0  ;;  %v1387_v39 = vpop.f32.mrf.mxu1 }
  0x99   : > { %v623_v56 = vmul.f32 %v1385_v38, %v1385_v38  ;;  %v554_v59 = vsel %vm553_vm1, %v1385_v38, 0.0  ;;  %v631_v29 = vmul.f32 %v1387_v39, %v1387_v39  ;;  %v569_v35 = vsel %vm553_vm1, %v1387_v39, 0.0 }
  0x9b   : > { %v655_v0 = vsel %vm553_vm1, %v623_v56, 0.0 }
  0x9f   : > { %v1393_v2 = vpop.f32.mrf.mxu3  ;;  %v1405_v47 = vpop.f32.mrf.mxu2 }
  0xa0   : > { %v1389_v40 = vpop.f32.mrf.mxu0  ;;  %v1391_v41 = vpop.f32.mrf.mxu1 }
  0xa1   : > { %v624_v54 = vmul.f32 %v1389_v40, %v1389_v40  ;;  %v555_v57 = vsel %vm553_vm1, %v1389_v40, 0.0  ;;  %v632_v36 = vmul.f32 %v1391_v41, %v1391_v41 }
  0xa2   : > { %v556_v63 = vadd.f32 %v555_v57, %v554_v59  ;;  %v571_v59 = vsel %vm553_vm1, %v1391_v41, 0.0 }
  0xa3   : > { %v656_v60 = vsel %vm553_vm1, %v624_v54, 0.0 }
  0xa4   : > { %v657_v5 = vadd.f32 %v656_v60, %v655_v0 }
  0xa7   : > { %v1399_v44 = vpop.f32.mrf.mxu3  ;;  %v1413_v51 = vpop.f32.mrf.mxu2 }
  0xa8   : > { %v1395_v42 = vpop.f32.mrf.mxu0  ;;  %v1397_v43 = vpop.f32.mrf.mxu1 }
  0xa9   : > { %v625_v58 = vmul.f32 %v1395_v42, %v1395_v42  ;;  %v557_v61 = vsel %vm553_vm1, %v1395_v42, 0.0  ;;  %v633_v60 = vmul.f32 %v1397_v43, %v1397_v43  ;;  %v573_v0 = vsel %vm553_vm1, %v1397_v43, 0.0 }
  0xaa   : > { %v558_v6 = vadd.f32 %v557_v61, %v556_v63  ;;  %v672_v63 = vsel %vm553_vm1, %v632_v36, 0.0 }
  0xab   : > { %v658_v1 = vsel %vm553_vm1, %v625_v58, 0.0  ;;  %v670_v58 = vsel %vm553_vm1, %v631_v29, 0.0 }
  0xac   : > { %v659_v12 = vadd.f32 %v658_v1, %v657_v5  ;;  %v674_v5 = vsel %vm553_vm1, %v633_v60, 0.0 }
  0xaf   : > { %v1407_v48 = vpop.f32.mrf.mxu3  ;;  %v1452_v14 = vpop.f32.mrf.mxu2 }
  0xb0   : > { %v1401_v45 = vpop.f32.mrf.mxu0  ;;  %v1403_v46 = vpop.f32.mrf.mxu1 }
  0xb1   : > { %v626_v62 = vmul.f32 %v1401_v45, %v1401_v45  ;;  %v559_v3 = vsel %vm553_vm1, %v1401_v45, 0.0  ;;  %v634_v1 = vmul.f32 %v1403_v46, %v1403_v46 }
  0xb2   : > { %v560_v13 = vadd.f32 %v559_v3, %v558_v6  ;;  %v575_v6 = vsel %vm553_vm1, %v1403_v46, 0.0 }
  0xb3   : > { %v660_v9 = vsel %vm553_vm1, %v626_v62, 0.0 }
  0xb4   : > { %v661_v19 = vadd.f32 %v660_v9, %v659_v12  ;;  %v676_v12 = vsel %vm553_vm1, %v634_v1, 0.0  ;;  %v641_v1 = vmul.f32 %v1452_v14, %v1452_v14 }
  0xb7   : > { %v1417_v53 = vpop.f32.mrf.mxu3  ;;  %v1480_v56 = vpop.f32.mrf.mxu2 }
  0xb8   : > { %v1409_v49 = vpop.f32.mrf.mxu0  ;;  %v1411_v50 = vpop.f32.mrf.mxu1 }
  0xb9   : > { %v627_v4 = vmul.f32 %v1409_v49, %v1409_v49  ;;  %v561_v10 = vsel %vm553_vm1, %v1409_v49, 0.0  ;;  %v635_v9 = vmul.f32 %v1411_v50, %v1411_v50 }
  0xba   : > { %v562_v20 = vadd.f32 %v561_v10, %v560_v13  ;;  %v577_v13 = vsel %vm553_vm1, %v1411_v50, 0.0 }
  0xbb   : > { %v662_v16 = vsel %vm553_vm1, %v627_v4, 0.0 }
  0xbc   : > { %v663_v23 = vadd.f32 %v662_v16, %v661_v19 }
  0xbf   : > { %v1454_v15 = vpop.f32.mrf.mxu3 }
  0xc0   : > { %v1415_v52 = vpop.f32.mrf.mxu0  ;;  %v1445_v8 = vpop.f32.mrf.mxu1 }
  0xc1   : > { %v628_v11 = vmul.f32 %v1415_v52, %v1415_v52  ;;  %v563_v17 = vsel %vm553_vm1, %v1415_v52, 0.0  ;;  %v636_v16 = vmul.f32 %v1445_v8, %v1445_v8 }
  0xc2   : > { %v564_v24 = vadd.f32 %v563_v17, %v562_v20  ;;  %v678_v20 = vsel %vm553_vm1, %v635_v9, 0.0  ;;  %v642_v9 = vmul.f32 %v1480_v56, %v1480_v56 }
  0xc3   : > { %v664_v21 = vsel %vm553_vm1, %v628_v11, 0.0 }
  0xc4   : > { %v665_v26 = vadd.f32 %v664_v21, %v663_v23  ;;  %v579_v21 = vsel %vm553_vm1, %v1445_v8, 0.0 }
  0xc7   : > { %v1482_v57 = vpop.f32.mrf.mxu3 }
  0xc8   : > { %v1443_v7 = vpop.f32.mrf.mxu0  ;;  %v1473_v34 = vpop.f32.mrf.mxu1 }
  0xc9   : > { %v629_v18 = vmul.f32 %v1443_v7, %v1443_v7  ;;  %v565_v22 = vsel %vm553_vm1, %v1443_v7, 0.0  ;;  %v581_v29 = vsel %vm553_vm1, %v1473_v34, 0.0 }
  0xca   : > { %v566_v27 = vadd.f32 %v565_v22, %v564_v24  ;;  %v637_v22 = vmul.f32 %v1473_v34, %v1473_v34 }
  0xcb   : > { %v666_v25 = vsel %vm553_vm1, %v629_v18, 0.0 }
  0xcc   : > { %v667_v32 = vadd.f32 %v666_v25, %v665_v26  ;;  %v1511_v25 = vpop.f32.mrf.mxu2 }
  0xcf   : > { %v1513_v26 = vpop.f32.mrf.mxu3 }
  0xd0   : > { %v1465_v28 = vpop.f32.mrf.mxu0  ;;  %v1504_v19 = vpop.f32.mrf.mxu1 }
  0xd1   : > { %v567_v30 = vsel %vm553_vm1, %v1465_v28, 0.0  ;;  %v630_v31 = vmul.f32 %v1465_v28, %v1465_v28  ;;  %v583_v36 = vsel %vm553_vm1, %v1504_v19, 0.0 }
  0xd2   : > { %v568_v33 = vadd.f32 %v567_v30, %v566_v27  ;;  %v680_v27 = vsel %vm553_vm1, %v636_v16, 0.0  ;;  %v638_v30 = vmul.f32 %v1504_v19, %v1504_v19  ;;  %v690_v16 = vsel %vm553_vm1, %v641_v1, 0.0 }
  0xd3   : > { %v668_v37 = vsel %vm553_vm1, %v630_v31, 0.0 }
  0xd4   : > { %v570_v54 = vadd.f32 %v569_v35, %v568_v33  ;;  %v669_v55 = vadd.f32 %v668_v37, %v667_v32  ;;  %v639_v33 = vmul.f32 %v1405_v47, %v1405_v47  ;;  %v682_v35 = vsel %vm553_vm1, %v637_v22, 0.0 }
  0xd5   : > { %v684_v60 = vsel %vm553_vm1, %v638_v30, 0.0  ;;  %v692_v22 = vsel %vm553_vm1, %v642_v9, 0.0  ;;  %v645_v30 = vmul.f32 %v1393_v2, %v1393_v2 }
  0xd6   : > { %v572_v61 = vadd.f32 %v571_v59, %v570_v54  ;;  %v671_v62 = vadd.f32 %v670_v58, %v669_v55  ;;  %v724_v55 = vld [vmem:[%s1912_s5] sm:$0xff]  ;;  %v585_v58 = vsel %vm553_vm1, %v1405_v47, 0.0  ;;  %v640_v59 = vmul.f32 %v1413_v51, %v1413_v51 }
  0xd7   : > { %744 = vmatpush.msrb.mxu1 %v724_v55  ;;  %768 = vmatpush.msrb.mxu2 %v724_v55 }
  0xd8   : > { %v574_v3 = vadd.f32 %v573_v0, %v572_v61  ;;  %v673_v4 = vadd.f32 %v672_v63, %v671_v62  ;;  %v686_v63 = vsel %vm553_vm1, %v639_v33, 0.0  ;;  %v587_v0 = vsel %vm553_vm1, %v1413_v51, 0.0 }
  0xda   : > { %v675_v10 = vadd.f32 %v674_v5, %v673_v4  ;;  %v576_v11 = vadd.f32 %v575_v6, %v574_v3  ;;  %v688_v5 = vsel %vm553_vm1, %v640_v59, 0.0  ;;  %v589_v6 = vsel %vm553_vm1, %v1452_v14, 0.0 }
  0xdb   : > { %v698_v59 = vsel %vm553_vm1, %v645_v30, 0.0 }
  0xdc   : > { %v578_v17 = vadd.f32 %v577_v13, %v576_v11  ;;  %v677_v18 = vadd.f32 %v676_v12, %v675_v10  ;;  %v1543_v12 = vpop.f32.mrf.mxu2  ;;  %v1545_v13 = vpop.f32.mrf.mxu3 }
  0xde   : > { %v580_v23 = vadd.f32 %v579_v21, %v578_v17  ;;  %v679_v24 = vadd.f32 %v678_v20, %v677_v18  ;;  %v591_v17 = vsel %vm553_vm1, %v1480_v56, 0.0  ;;  %v643_v18 = vmul.f32 %v1511_v25, %v1511_v25 }
  0xe0   : > { %v582_v31 = vadd.f32 %v581_v29, %v580_v23  ;;  %v681_v32 = vadd.f32 %v680_v27, %v679_v24  ;;  %v593_v23 = vsel %vm553_vm1, %v1511_v25, 0.0  ;;  %v644_v24 = vmul.f32 %v1543_v12, %v1543_v12 }
  0xe2   : > { %v683_v37 = vadd.f32 %v682_v35, %v681_v32  ;;  %v584_v54 = vadd.f32 %v583_v36, %v582_v31  ;;  %v694_v31 = vsel %vm553_vm1, %v643_v18, 0.0  ;;  %v595_v32 = vsel %vm553_vm1, %v1543_v12, 0.0 }
  0xe3   : > { %v597_v36 = vsel %vm553_vm1, %v1393_v2, 0.0 }
  0xe4   : > { %v586_v61 = vadd.f32 %v585_v58, %v584_v54  ;;  %v685_v62 = vadd.f32 %v684_v60, %v683_v37  ;;  %v646_v37 = vmul.f32 %v1399_v44, %v1399_v44  ;;  %v696_v54 = vsel %vm553_vm1, %v644_v24, 0.0 }
  0xe5   : > { %v599_v60 = vsel %vm553_vm1, %v1399_v44, 0.0 }
  0xe6   : > { %v588_v3 = vadd.f32 %v587_v0, %v586_v61  ;;  %v687_v4 = vadd.f32 %v686_v63, %v685_v62  ;;  %v647_v61 = vmul.f32 %v1407_v48, %v1407_v48  ;;  %v1572_v0 = vpop.f32.mrf.mxu3  ;;  %v700_v1 = vsel %vm553_vm1, %v646_v37, 0.0 }
  0xe8   : > { %v689_v10 = vadd.f32 %v688_v5, %v687_v4  ;;  %v590_v11 = vadd.f32 %v589_v6, %v588_v3  ;;  %v601_v3 = vsel %vm553_vm1, %v1407_v48, 0.0  ;;  %v648_v4 = vmul.f32 %v1417_v53, %v1417_v53 }
  0xe9   : > { %v702_v9 = vsel %vm553_vm1, %v647_v61, 0.0 }
  0xea   : > { %v592_v20 = vadd.f32 %v591_v17, %v590_v11  ;;  %v691_v21 = vadd.f32 %v690_v16, %v689_v10  ;;  %v603_v10 = vsel %vm553_vm1, %v1417_v53, 0.0  ;;  %v649_v11 = vmul.f32 %v1454_v15, %v1454_v15 }
  0xeb   : > { %v704_v18 = vsel %vm553_vm1, %v648_v4, 0.0 }
  0xec   : > { %v594_v27 = vadd.f32 %v593_v23, %v592_v20  ;;  %v693_v29 = vadd.f32 %v692_v22, %v691_v21  ;;  %v605_v20 = vsel %vm553_vm1, %v1454_v15, 0.0  ;;  %v650_v21 = vmul.f32 %v1482_v57, %v1482_v57 }
  0xed   : > { %v706_v24 = vsel %vm553_vm1, %v649_v11, 0.0 }
  0xee   : > { %v695_v33 = vadd.f32 %v694_v31, %v693_v29  ;;  %v596_v35 = vadd.f32 %v595_v32, %v594_v27  ;;  %v607_v27 = vsel %vm553_vm1, %v1482_v57, 0.0  ;;  %v651_v29 = vmul.f32 %v1513_v26, %v1513_v26 }
  0xef   : > { %v708_v32 = vsel %vm553_vm1, %v650_v21, 0.0 }
  0xf0   : > { %v598_v55 = vadd.f32 %v597_v36, %v596_v35  ;;  %v697_v58 = vadd.f32 %v696_v54, %v695_v33  ;;  %v609_v33 = vsel %vm553_vm1, %v1513_v26, 0.0  ;;  %v652_v35 = vmul.f32 %v1545_v13, %v1545_v13  ;;  %v1599_v54 = vpop.f32.mrf.mxu3 }
  0xf2   : > { %v600_v62 = vadd.f32 %v599_v60, %v598_v55  ;;  %v699_v63 = vadd.f32 %v698_v59, %v697_v58  ;;  %v710_v55 = vsel %vm553_vm1, %v651_v29, 0.0  ;;  %v611_v58 = vsel %vm553_vm1, %v1545_v13, 0.0 }
  0xf3   : > { %v653_v59 = vmul.f32 %v1572_v0, %v1572_v0 }
  0xf4   : > { %v602_v5 = vadd.f32 %v601_v3, %v600_v62  ;;  %v701_v6 = vadd.f32 %v700_v1, %v699_v63  ;;  %v712_v62 = vsel %vm553_vm1, %v652_v35, 0.0  ;;  %v613_v63 = vsel %vm553_vm1, %v1572_v0, 0.0 }
  0xf5   : > { %v654_v1 = vmul.f32 %v1599_v54, %v1599_v54 }
  0xf6   : > { %v703_v16 = vadd.f32 %v702_v9, %v701_v6  ;;  %v604_v17 = vadd.f32 %v603_v10, %v602_v5  ;;  %v714_v5 = vsel %vm553_vm1, %v653_v59, 0.0  ;;  %v615_v6 = vsel %vm553_vm1, %v1599_v54, 0.0 }
  0xf7   : > { %v716_v11 = vsel %vm553_vm1, %v654_v1, 0.0 }
  0xf8   : > { %v606_v22 = vadd.f32 %v605_v20, %v604_v17  ;;  %v705_v23 = vadd.f32 %v704_v18, %v703_v16 }
  0xfa   : > { %v608_v30 = vadd.f32 %v607_v27, %v606_v22  ;;  %v707_v31 = vadd.f32 %v706_v24, %v705_v23 }
  0xfc   : > { %v610_v36 = vadd.f32 %v609_v33, %v608_v30  ;;  %v709_v37 = vadd.f32 %v708_v32, %v707_v31 }
  0xfe   : > { %v612_v60 = vadd.f32 %v611_v58, %v610_v36  ;;  %v711_v61 = vadd.f32 %v710_v55, %v709_v37 }
 0x100   : > { %v713_v3 = vadd.f32 %v712_v62, %v711_v61  ;;  %v614_v4 = vadd.f32 %v613_v63, %v612_v60 }
 0x102   : > { %v715_v9 = vadd.f32 %v714_v5, %v713_v3  ;;  %v616_v10 = vadd.f32 %v615_v6, %v614_v4 }
 0x104   : > { %v617_v16 = vrot.slane %v616_v10, 4  ;;  %v717_v17 = vadd.f32 %v716_v11, %v715_v9 }
 0x106   : > { %v618_v18 = vadd.f32 %v617_v16, %v616_v10  ;;  %v718_v20 = vrot.slane %v717_v17, 4 }
 0x108   : > { %v619_v21 = vrot.slane %v618_v18, 2  ;;  %v719_v22 = vadd.f32 %v718_v20, %v717_v17 }
 0x10a   : > { %v620_v23 = vadd.f32 %v619_v21, %v618_v18  ;;  %v720_v24 = vrot.slane %v719_v22, 2 }
 0x10c   : > { %v621_v27 = vrot.slane %v620_v23, 1  ;;  %v721_v29 = vadd.f32 %v720_v24, %v719_v22 }
 0x10e   : > { %v622_v30 = vadd.f32 %v621_v27, %v620_v23  ;;  %v722_v31 = vrot.slane %v721_v29, 1 }
 0x110   : > { %1128 = vmatmul.msk.f32.vlgmr.msrb.gmra.mxu1 %vm553_vm1, %v622_v30  ;;  %v723_v32 = vadd.f32 %v722_v31, %v721_v29 }
 0x112   : > { %1129 = vmatmul.msk.f32.vlgmr.msrb.gmra.mxu2 %vm553_vm1, %v723_v32  ;;  %v1706_v32 = vld [vmem:[%s1911_s4] ss:$0 sm:$0xff] }
 0x18d   : > { %v746_v33 = vpop.f32.mrf.mxu1 }
 0x18e   : > { %v749_v35 = vmul.f32 0.00390625, %v746_v33 }
 0x190   : > { %v774_v37 = vmul.f32 %v749_v35, %v749_v35  ;;  %v1617_v4 = vperm.slane %v749_v35, 0 }
 0x192   : > { %v778_v6 = vsub.f32 %v1385_v38, %v1617_v4  ;;  %v779_v9 = vsub.f32 %v1389_v40, %v1617_v4  ;;  %v780_v11 = vsub.f32 %v1395_v42, %v1617_v4  ;;  %v781_v16 = vsub.f32 %v1401_v45, %v1617_v4 }
 0x193   : > { %v782_v17 = vsub.f32 %v1409_v49, %v1617_v4  ;;  %v783_v18 = vsub.f32 %v1415_v52, %v1617_v4  ;;  %v784_v20 = vsub.f32 %v1443_v7, %v1617_v4  ;;  %v785_v38 = vsub.f32 %v1465_v28, %v1617_v4 }
 0x194   : > { %v786_v40 = vsub.f32 %v1387_v39, %v1617_v4  ;;  %v787_v42 = vsub.f32 %v1391_v41, %v1617_v4  ;;  %v788_v45 = vsub.f32 %v1397_v43, %v1617_v4  ;;  %v789_v49 = vsub.f32 %v1403_v46, %v1617_v4 }
 0x195   : > { %v770_v36 = vpop.f32.mrf.mxu2  ;;  %v790_v52 = vsub.f32 %v1411_v50, %v1617_v4  ;;  %v791_v7 = vsub.f32 %v1445_v8, %v1617_v4  ;;  %v792_v39 = vsub.f32 %v1473_v34, %v1617_v4  ;;  %v793_v41 = vsub.f32 %v1504_v19, %v1617_v4 }
 0x196   : > { %v773_v55 = vmul.f32 0.00390625, %v770_v36  ;;  %v794_v43 = vsub.f32 %v1405_v47, %v1617_v4  ;;  %v795_v46 = vsub.f32 %v1413_v51, %v1617_v4  ;;  %v796_v50 = vsub.f32 %v1452_v14, %v1617_v4 }
 0x197   : > { %v797_v28 = vsub.f32 %v1480_v56, %v1617_v4  ;;  %v798_v8 = vsub.f32 %v1511_v25, %v1617_v4  ;;  %v799_v34 = vsub.f32 %v1543_v12, %v1617_v4  ;;  %v800_v19 = vsub.f32 %v1393_v2, %v1617_v4  ;;  %v1681_v2 = vld [vmem:[%s1910_s3] ss:$0 sm:$0xff] }
 0x198   : > { %v775_v58 = vsub.f32 %v773_v55, %v774_v37  ;;  %v801_v47 = vsub.f32 %v1399_v44, %v1617_v4  ;;  %v802_v51 = vsub.f32 %v1407_v48, %v1617_v4  ;;  %v803_v14 = vsub.f32 %v1417_v53, %v1617_v4 }
 0x199   : > { %v804_v56 = vsub.f32 %v1454_v15, %v1617_v4  ;;  %v805_v25 = vsub.f32 %v1482_v57, %v1617_v4  ;;  %v806_v44 = vsub.f32 %v1513_v26, %v1617_v4  ;;  %v807_v48 = vsub.f32 %v1545_v13, %v1617_v4 }
 0x19a   : > { %v776_v59 = vmax.f32 %v775_v58, 0.0  ;;  %v808_v53 = vsub.f32 %v1572_v0, %v1617_v4  ;;  %v809_v57 = vsub.f32 %v1599_v54, %v1617_v4 }
 0x19c   : > { %v810_v60 = vadd.f32 1e-05, %v776_v59 }
 0x19e   : > { %1240 = vrsqrt.f32 %v810_v60  ;;  %vm817_vm3 = vweird.f32 %v810_v60 }
 0x1a4   : > { %v1241_v61 = vpop.eup %1240 }
 0x1a5   : > { %v812_v62 = vmul.f32 %v1241_v61, %v810_v60  ;;  %vm818_vm2 = vweird.f32 %v1241_v61 }
 0x1a6   : > { %vm819_vm4 = vmor %vm817_vm3, %vm818_vm2 }
 0x1a7   : > { %v813_v63 = vmul.f32 %v1241_v61, %v812_v62 }
 0x1a9   : > { %v814_v1 = vmul.f32 0.5, %v813_v63 }
 0x1ab   : > { %v815_v3 = vsub.f32 1.5, %v814_v1 }
 0x1ad   : > { %v816_v5 = vmul.f32 %v1241_v61, %v815_v3 }
 0x1af   : > { %v820_v10 = vsel %vm819_vm4, %v1241_v61, %v816_v5 }
 0x1b0   : > { %v1645_v21 = vperm.slane %v820_v10, 0 }
 0x1b2   : > { %v822_v12 = vmul.f32 %v1645_v21, %v778_v6  ;;  %v823_v15 = vmul.f32 %v1645_v21, %v779_v9  ;;  %v824_v22 = vmul.f32 %v1645_v21, %v780_v11  ;;  %v825_v23 = vmul.f32 %v1645_v21, %v781_v16 }
 0x1b3   : > { %v826_v24 = vmul.f32 %v1645_v21, %v782_v17  ;;  %v827_v27 = vmul.f32 %v1645_v21, %v783_v18  ;;  %v828_v26 = vmul.f32 %v1645_v21, %v784_v20  ;;  %v829_v13 = vmul.f32 %v1645_v21, %v785_v38 }
 0x1b4   : > { %v830_v29 = vmul.f32 %v1645_v21, %v786_v40  ;;  %v831_v0 = vmul.f32 %v1645_v21, %v787_v42  ;;  %v832_v30 = vmul.f32 %v1645_v21, %v788_v45  ;;  %v833_v54 = vmul.f32 %v1645_v21, %v789_v49 }
 0x1b5   : > { %v858_v31 = vmul.f32 %v1681_v2, %v822_v12  ;;  %v834_v33 = vmul.f32 %v1645_v21, %v790_v52  ;;  %v835_v35 = vmul.f32 %v1645_v21, %v791_v7  ;;  %v836_v36 = vmul.f32 %v1645_v21, %v792_v39 }
 0x1b6   : > { %v859_v37 = vmul.f32 %v1681_v2, %v823_v15  ;;  %v837_v55 = vmul.f32 %v1645_v21, %v793_v41  ;;  %v838_v58 = vmul.f32 %v1645_v21, %v794_v43  ;;  %v839_v59 = vmul.f32 %v1645_v21, %v795_v46 }
 0x1b7   : > { %v860_v60 = vmul.f32 %v1681_v2, %v824_v22  ;;  %v1717_v61 = vmul.f32 %v1645_v21, %v796_v50  ;;  %v1720_v62 = vmul.f32 %v1645_v21, %v797_v28  ;;  %v1723_v63 = vmul.f32 %v1645_v21, %v798_v8 }
 0x1b8   : > { %v861_v1 = vmul.f32 %v1681_v2, %v825_v23  ;;  %v1727_v3 = vmul.f32 %v1645_v21, %v799_v34  ;;  %v1730_v4 = vmul.f32 %v1645_v21, %v800_v19  ;;  %v862_v5 = vmul.f32 %v1681_v2, %v826_v24 }
 0x1b9   : > { %v894_v6 = vadd.f32 %v1706_v32, %v858_v31  ;;  %v1735_v9 = vmul.f32 %v1645_v21, %v801_v47  ;;  %v1738_v10 = vmul.f32 %v1645_v21, %v802_v51  ;;  %v863_v11 = vmul.f32 %v1681_v2, %v827_v27 }
 0x1ba   : > { %v895_v16 = vadd.f32 %v1706_v32, %v859_v37  ;;  %v1743_v17 = vmul.f32 %v1645_v21, %v803_v14  ;;  %v1746_v18 = vmul.f32 %v1645_v21, %v804_v56  ;;  %v864_v20 = vmul.f32 %v1681_v2, %v828_v26 }
 0x1bb   : > { %v896_v38 = vadd.f32 %v1706_v32, %v860_v60  ;;  %v1751_v40 = vmul.f32 %v1645_v21, %v805_v25  ;;  %v1754_v42 = vmul.f32 %v1645_v21, %v806_v44  ;;  %v865_v45 = vmul.f32 %v1681_v2, %v829_v13 }
 0x1bc   : > { %v897_v49 = vadd.f32 %v1706_v32, %v861_v1  ;;  %v1759_v52 = vmul.f32 %v1645_v21, %v807_v48  ;;  %v866_v7 = vmul.f32 %v1681_v2, %v830_v29  ;;  %v898_v39 = vadd.f32 %v1706_v32, %v862_v5 }
 0x1bd   : > { %v926_v41 = vmax.f32 %v894_v6, 0.0  ;;  %v1764_v43 = vmul.f32 %v1645_v21, %v808_v53  ;;  %v867_v46 = vmul.f32 %v1681_v2, %v831_v0  ;;  %v899_v50 = vadd.f32 %v1706_v32, %v863_v11 }
 0x1be   : > { %v927_v28 = vmax.f32 %v895_v16, 0.0  ;;  %v1769_v8 = vmul.f32 %v1645_v21, %v809_v57  ;;  %v868_v34 = vmul.f32 %v1681_v2, %v832_v30  ;;  %v900_v19 = vadd.f32 %v1706_v32, %v864_v20 }
 0x1bf   : > { %v928_v47 = vmax.f32 %v896_v38, 0.0  ;;  %v869_v51 = vmul.f32 %v1681_v2, %v833_v54  ;;  %v870_v14 = vmul.f32 %v1681_v2, %v834_v33  ;;  %v901_v56 = vadd.f32 %v1706_v32, %v865_v45 }
 0x1c0   : > { %v929_v25 = vmax.f32 %v897_v49, 0.0  ;;  %v871_v12 = vmul.f32 %v1681_v2, %v835_v35  ;;  %v902_v44 = vadd.f32 %v1706_v32, %v866_v7  ;;  %v930_v48 = vmax.f32 %v898_v39, 0.0 }
 0x1c1   : > { %v958_v53 = vpack.c.bf16 %v926_v41, %v926_v41  ;;  %v872_v21 = vmul.f32 %v1681_v2, %v836_v36  ;;  %v903_v15 = vadd.f32 %v1706_v32, %v867_v46  ;;  %v931_v57 = vmax.f32 %v899_v50, 0.0 }
 0x1c2   : > { %v959_v22 = vpack.c.bf16 %v927_v28, %v927_v28  ;;  %v873_v23 = vmul.f32 %v1681_v2, %v837_v55  ;;  %v904_v24 = vadd.f32 %v1706_v32, %v868_v34  ;;  %v932_v27 = vmax.f32 %v900_v19, 0.0 }
 0x1c3   : > { %v960_v26 = vpack.c.bf16 %v928_v47, %v928_v47  ;;  %v905_v13 = vadd.f32 %v1706_v32, %v869_v51  ;;  %v933_v29 = vmax.f32 %v901_v56, 0.0  ;;  %v961_v0 = vpack.c.bf16 %v929_v25, %v929_v25  ;;  %991 = vst.msk [vmem:[%s1783_s26] sm:$0xf] %vm990_vm5, %v958_v53 }
 0x1c4   : > { %v874_v30 = vmul.f32 %v1681_v2, %v838_v58  ;;  %v906_v54 = vadd.f32 %v1706_v32, %v870_v14  ;;  %v934_v31 = vmax.f32 %v902_v44, 0.0  ;;  %v962_v33 = vpack.c.bf16 %v930_v48, %v930_v48  ;;  %992 = vst.msk [vmem:[%s1783_s26 + $0x4] sm:$0xf] %vm990_vm5, %v959_v22 }
 0x1c5   : > { %v875_v35 = vmul.f32 %v1681_v2, %v839_v59  ;;  %v907_v36 = vadd.f32 %v1706_v32, %v871_v12  ;;  %v935_v37 = vmax.f32 %v903_v15, 0.0  ;;  %v963_v55 = vpack.c.bf16 %v931_v57, %v931_v57  ;;  %993 = vst.msk [vmem:[%s1783_s26 + $0x8] sm:$0xf] %vm990_vm5, %v960_v26 }
 0x1c6   : > { %v876_v60 = vmul.f32 %v1681_v2, %v1717_v61  ;;  %v908_v58 = vadd.f32 %v1706_v32, %v872_v21  ;;  %v936_v1 = vmax.f32 %v904_v24, 0.0  ;;  %v964_v5 = vpack.c.bf16 %v932_v27, %v932_v27  ;;  %994 = vst.msk [vmem:[%s1783_s26 + $0xc] sm:$0xf] %vm990_vm5, %v961_v0 }
 0x1c7   : > { %v877_v59 = vmul.f32 %v1681_v2, %v1720_v62  ;;  %v909_v6 = vadd.f32 %v1706_v32, %v873_v23  ;;  %v937_v11 = vmax.f32 %v905_v13, 0.0  ;;  %v965_v16 = vpack.c.bf16 %v933_v29, %v933_v29  ;;  %995 = vst.msk [vmem:[%s1783_s26 + $0x10] sm:$0xf] %vm990_vm5, %v962_v33 }
 0x1c8   : > { %v878_v61 = vmul.f32 %v1681_v2, %v1723_v63  ;;  %v910_v20 = vadd.f32 %v1706_v32, %v874_v30  ;;  %v938_v38 = vmax.f32 %v906_v54, 0.0  ;;  %v966_v45 = vpack.c.bf16 %v934_v31, %v934_v31  ;;  %996 = vst.msk [vmem:[%s1783_s26 + $0x14] sm:$0xf] %vm990_vm5, %v963_v55 }
 0x1c9   : > { %v879_v62 = vmul.f32 %v1681_v2, %v1727_v3  ;;  %v911_v49 = vadd.f32 %v1706_v32, %v875_v35  ;;  %v939_v7 = vmax.f32 %v907_v36, 0.0  ;;  %v967_v39 = vpack.c.bf16 %v935_v37, %v935_v37  ;;  %997 = vst.msk [vmem:[%s1783_s26 + $0x18] sm:$0xf] %vm990_vm5, %v964_v5 }
 0x1ca   : > { %v880_v63 = vmul.f32 %v1681_v2, %v1730_v4  ;;  %v912_v41 = vadd.f32 %v1706_v32, %v876_v60  ;;  %v940_v46 = vmax.f32 %v908_v58, 0.0  ;;  %v968_v50 = vpack.c.bf16 %v936_v1, %v936_v1  ;;  %998 = vst.msk [vmem:[%s1783_s26 + $0x1c] sm:$0xf] %vm990_vm5, %v965_v16 }
 0x1cb   : > { %v881_v3 = vmul.f32 %v1681_v2, %v1735_v9  ;;  %v913_v28 = vadd.f32 %v1706_v32, %v877_v59  ;;  %v941_v34 = vmax.f32 %v909_v6, 0.0  ;;  %v969_v19 = vpack.c.bf16 %v937_v11, %v937_v11  ;;  %999 = vst.msk [vmem:[%s1783_s26 + $0x20] sm:$0xf] %vm990_vm5, %v966_v45 }
 0x1cc   : > { %v882_v4 = vmul.f32 %v1681_v2, %v1738_v10  ;;  %v914_v47 = vadd.f32 %v1706_v32, %v878_v61  ;;  %v942_v51 = vmax.f32 %v910_v20, 0.0  ;;  %v970_v14 = vpack.c.bf16 %v938_v38, %v938_v38  ;;  %1000 = vst.msk [vmem:[%s1783_s26 + $0x24] sm:$0xf] %vm990_vm5, %v967_v39 }
 0x1cd   : > { %v883_v9 = vmul.f32 %v1681_v2, %v1743_v17  ;;  %v915_v56 = vadd.f32 %v1706_v32, %v879_v62  ;;  %v943_v25 = vmax.f32 %v911_v49, 0.0  ;;  %v971_v12 = vpack.c.bf16 %v939_v7, %v939_v7  ;;  %1001 = vst.msk [vmem:[%s1783_s26 + $0x28] sm:$0xf] %vm990_vm5, %v968_v50 }
 0x1ce   : > { %v884_v10 = vmul.f32 %v1681_v2, %v1746_v18  ;;  %v916_v44 = vadd.f32 %v1706_v32, %v880_v63  ;;  %v944_v48 = vmax.f32 %v912_v41, 0.0  ;;  %v972_v53 = vpack.c.bf16 %v940_v46, %v940_v46  ;;  %1002 = vst.msk [vmem:[%s1783_s26 + $0x2c] sm:$0xf] %vm990_vm5, %v969_v19 }
 0x1cf   : > { %v885_v17 = vmul.f32 %v1681_v2, %v1751_v40  ;;  %v917_v21 = vadd.f32 %v1706_v32, %v881_v3  ;;  %v945_v15 = vmax.f32 %v913_v28, 0.0  ;;  %v973_v57 = vpack.c.bf16 %v941_v34, %v941_v34  ;;  %1003 = vst.msk [vmem:[%s1783_s26 + $0x30] sm:$0xf] %vm990_vm5, %v970_v14 }
 0x1d0   : > { %v886_v18 = vmul.f32 %v1681_v2, %v1754_v42  ;;  %v918_v22 = vadd.f32 %v1706_v32, %v882_v4  ;;  %v946_v23 = vmax.f32 %v914_v47, 0.0  ;;  %v974_v24 = vpack.c.bf16 %v942_v51, %v942_v51  ;;  %1004 = vst.msk [vmem:[%s1783_s26 + $0x34] sm:$0xf] %vm990_vm5, %v971_v12 }
 0x1d1   : > { %v887_v40 = vmul.f32 %v1681_v2, %v1759_v52  ;;  %v919_v27 = vadd.f32 %v1706_v32, %v883_v9  ;;  %v947_v26 = vmax.f32 %v915_v56, 0.0  ;;  %v975_v13 = vpack.c.bf16 %v943_v25, %v943_v25  ;;  %1005 = vst.msk [vmem:[%s1783_s26 + $0x38] sm:$0xf] %vm990_vm5, %v972_v53 }
 0x1d2   : > { %v888_v42 = vmul.f32 %v1681_v2, %v1764_v43  ;;  %v920_v29 = vadd.f32 %v1706_v32, %v884_v10  ;;  %v948_v0 = vmax.f32 %v916_v44, 0.0  ;;  %v976_v30 = vpack.c.bf16 %v944_v48, %v944_v48  ;;  %1006 = vst.msk [vmem:[%s1783_s26 + $0x3c] sm:$0xf] %vm990_vm5, %v973_v57 }
 0x1d3   : > { %v889_v52 = vmul.f32 %v1681_v2, %v1769_v8  ;;  %v921_v54 = vadd.f32 %v1706_v32, %v885_v17  ;;  %v949_v31 = vmax.f32 %v917_v21, 0.0  ;;  %v977_v33 = vpack.c.bf16 %v945_v15, %v945_v15  ;;  %1007 = vst.msk [vmem:[%s1783_s26 + $0x40] sm:$0xf] %vm990_vm5, %v974_v24 }
 0x1d4   : > { %v922_v43 = vadd.f32 %v1706_v32, %v886_v18  ;;  %v950_v35 = vmax.f32 %v918_v22, 0.0  ;;  %v978_v36 = vpack.c.bf16 %v946_v23, %v946_v23  ;;  %v923_v37 = vadd.f32 %v1706_v32, %v887_v40  ;;  %1008 = vst.msk [vmem:[%s1783_s26 + $0x44] sm:$0xf] %vm990_vm5, %v975_v13 }
 0x1d5   : > { %v951_v55 = vmax.f32 %v919_v27, 0.0  ;;  %v979_v2 = vpack.c.bf16 %v947_v26, %v947_v26  ;;  %v924_v8 = vadd.f32 %v1706_v32, %v888_v42  ;;  %v952_v60 = vmax.f32 %v920_v29, 0.0  ;;  %1009 = vst.msk [vmem:[%s1783_s26 + $0x48] sm:$0xf] %vm990_vm5, %v976_v30 }
 0x1d6   : > { %v980_v58 = vpack.c.bf16 %v948_v0, %v948_v0  ;;  %v925_v1 = vadd.f32 %v1706_v32, %v889_v52  ;;  %v953_v5 = vmax.f32 %v921_v54, 0.0  ;;  %v981_v59 = vpack.c.bf16 %v949_v31, %v949_v31  ;;  %1010 = vst.msk [vmem:[%s1783_s26 + $0x4c] sm:$0xf] %vm990_vm5, %v977_v33 }
 0x1d7   : > { %v954_v6 = vmax.f32 %v922_v43, 0.0  ;;  %v982_v11 = vpack.c.bf16 %v950_v35, %v950_v35  ;;  %1011 = vst.msk [vmem:[%s1783_s26 + $0x50] sm:$0xf] %vm990_vm5, %v978_v36  ;;  %v955_v16 = vmax.f32 %v923_v37, 0.0  ;;  %v983_v61 = vpack.c.bf16 %v951_v55, %v951_v55 }
 0x1d8   : > { %1012 = vst.msk [vmem:[%s1783_s26 + $0x54] sm:$0xf] %vm990_vm5, %v979_v2  ;;  %v956_v20 = vmax.f32 %v924_v8, 0.0  ;;  %v984_v32 = vpack.c.bf16 %v952_v60, %v952_v60  ;;  %v957_v38 = vmax.f32 %v925_v1, 0.0  ;;  %v985_v45 = vpack.c.bf16 %v953_v5, %v953_v5 }
 0x1d9   : > { %1013 = vst.msk [vmem:[%s1783_s26 + $0x58] sm:$0xf] %vm990_vm5, %v980_v58  ;;  %v986_v62 = vpack.c.bf16 %v954_v6, %v954_v6  ;;  %v987_v49 = vpack.c.bf16 %v955_v16, %v955_v16 }
 0x1da   : > { %1014 = vst.msk [vmem:[%s1783_s26 + $0x5c] sm:$0xf] %vm990_vm5, %v981_v59  ;;  %v988_v7 = vpack.c.bf16 %v956_v20, %v956_v20  ;;  %v989_v39 = vpack.c.bf16 %v957_v38, %v957_v38 }
 0x1db   : > { %1015 = vst.msk [vmem:[%s1783_s26 + $0x60] sm:$0xf] %vm990_vm5, %v982_v11 }
 0x1dc   : > { %1016 = vst.msk [vmem:[%s1783_s26 + $0x64] sm:$0xf] %vm990_vm5, %v983_v61 }
 0x1dd   : > { %1017 = vst.msk [vmem:[%s1783_s26 + $0x68] sm:$0xf] %vm990_vm5, %v984_v32 }
 0x1de   : > { %1018 = vst.msk [vmem:[%s1783_s26 + $0x6c] sm:$0xf] %vm990_vm5, %v985_v45 }
 0x1df   : > { %1019 = vst.msk [vmem:[%s1783_s26 + $0x70] sm:$0xf] %vm990_vm5, %v986_v62 }
 0x1e0   : > { %1020 = vst.msk [vmem:[%s1783_s26 + $0x74] sm:$0xf] %vm990_vm5, %v987_v49 }
 0x1e1   : > { %1021 = vst.msk [vmem:[%s1783_s26 + $0x78] sm:$0xf] %vm990_vm5, %v988_v7 }
 0x1e2   : > { %1022 = vst.msk [vmem:[%s1783_s26 + $0x7c] sm:$0xf] %vm990_vm5, %v989_v39 }
 0x1e3 PF: > { %s16_s21 = sadd.s32 1, %s1248_s21  }
 0x1e4   : > { %p13_p4 = scmp.ge.s32.totalorder %s16_s21, 4  }
 0x1e6   :  { %15 = sbr.rel (!%p13_p4) target bundleno = 1 (0x1), region = 77 }

</bundles_post_ra>
